<compile_context>
chip_gen: v5e
topology: v5e:2x2
jax: 0.10.0
libtpu: 0.0.40
codegen_flags: <defaults>
</compile_context>

<pallas_src>
import numpy as np
import jax
import jax.numpy as jnp
from jax.experimental import pallas as pl
from jax.experimental.pallas import tpu as pltpu


def graph_grad_np(adj_mx: np.ndarray) -> np.ndarray:
    """NumPy port of the PyTorch graph_grad helper (deterministic)."""
    num_nodes = adj_mx.shape[0]
    num_edges = int((adj_mx > 0.0).sum())
    grad = np.zeros((num_nodes, num_edges), dtype=np.float32)
    e = 0
    for i in range(num_nodes):
        for j in range(num_nodes):
            if adj_mx[i, j] == 0:
                continue
            grad[i, e] = 1.0
            grad[j, e] = -1.0
            e += 1
    return grad


# ----------------------------------------------------------------------------
# Sizing helpers (padded-layout aware).
# ----------------------------------------------------------------------------
def _round_up(x: int, m: int) -> int:
    return ((x + m - 1) // m) * m


def _padded_bytes(shape, itemsize: int) -> int:
    """VMEM footprint of one buffer: last dim -> 128 lanes, 2nd-last -> 8 sublanes."""
    shape = tuple(int(d) for d in shape)
    lead = 1
    for d in shape[:-2]:
        lead *= d
    sub = _round_up(shape[-2], 8) if len(shape) >= 2 else 1
    lane = _round_up(shape[-1], 128)
    return lead * sub * lane * itemsize


def _vmem_budget_bytes() -> int:
    """~75% of physical per-core VMEM (leaves compiler/internal scratch headroom)."""
    cap = 64 * 1024 * 1024
    try:
        cap = int(getattr(pltpu.get_tpu_info(), "vmem_capacity_bytes", cap))
    except Exception:
        pass
    return int(cap * 3 // 4)


# ----------------------------------------------------------------------------
# Kernels.
# ----------------------------------------------------------------------------
def _decode_kfold_kernel(x_ref, gk_ref, o_ref):
    # x_ref:  (b_tile, T*NL)   trajectory folded into the contraction
    # gk_ref: (T*NL, e_tile)   tiled, pre-scaled, lane-dense operator tile
    # o_ref:  (b_tile, e_tile)
    o_ref[...] = jnp.dot(
        x_ref[...], gk_ref[...], preferred_element_type=jnp.float32
    ).astype(o_ref.dtype)


def _decode_mfold_kernel(x_ref, gk_ref, o_ref):
    # x_ref:  (T, b_tile, NL)  trajectory folded into the matmul M dimension
    # gk_ref: (NL, e_tile)
    # o_ref:  (b_tile, e_tile)
    t, m, k = x_ref.shape
    y = jnp.dot(
        x_ref[...].reshape(t * m, k), gk_ref[...],
        preferred_element_type=jnp.float32,
    )
    o_ref[...] = y.reshape(t, m, y.shape[-1]).sum(axis=0).astype(o_ref.dtype)


# ----------------------------------------------------------------------------
# Wrapper.
# ----------------------------------------------------------------------------
def decoder_forward(inputs, grad, num_nodes, num_edges, output_dim, *,
                    use_bf16: bool = False):
    """inputs: (P, T, B, N*L) float32; grad: (N, E = num_edges*output_dim)."""
    P, T, B, NL = inputs.shape
    N = num_nodes
    assert NL % N == 0
    L = NL // N
    E = num_edges * output_dim
    assert grad.shape == (N, E)

    in_dtype = jnp.bfloat16 if use_bf16 else jnp.float32
    isz = 2 if use_bf16 else 4

    # Operator: repeat each node row L times (folds the latent mean into the
    # contraction), pre-scale by 1/(T*L), zero-pad E to a lane-dense multiple
    # of 128 so output stores are unmasked.
    e_pad = _round_up(E, 128)
    gk = jnp.repeat(grad.astype(jnp.float32), L, axis=0) * (1.0 / float(T * L))
    gk = jnp.pad(gk, ((0, 0), (0, e_pad - E)))          # (N*L, e_pad)

    budget = _vmem_budget_bytes()

    # Path choice: when NL is lane-sparse (< 128), fold T into the contraction
    # (K = T*NL, Gk tiled T-fold) -- one lane-dense matmul per block. Otherwise
    # keep the original layout and fold T into the matmul M dimension.
    kfold = (NL < 128) and (2 * _padded_bytes((T * NL, 128), isz) <= budget // 4)

    if kfold:
        k_rows = T * NL
        gk_op = jnp.tile(gk, (T, 1)).astype(in_dtype)            # (T*NL, e_pad)
        # One XLA transpose in the wrapper so K = T*NL is contiguous per row.
        x_op = jnp.transpose(inputs.astype(in_dtype), (0, 2, 1, 3)).reshape(P, B, T * NL)
    else:
        k_rows = NL
        gk_op = gk.astype(in_dtype)                              # (NL, e_pad)
        x_op = inputs.astype(in_dtype)                           # (P, T, B, NL)

    # e_tile: largest multiple-of-128 divisor of e_pad whose (double-buffered,
    # padded) Gk tile stays under ~25% of the budget. E-tiling only kicks in
    # for large graphs; X stays resident across the E axis either way.
    e_tile = 128
    for d in range(e_pad, 127, -128):
        if e_pad % d != 0:
            continue
        if 2 * _padded_bytes((k_rows, d), isz) <= budget // 4:
            e_tile = d
            break

    # b_tile: largest multiple-of-8 divisor of B (or full B) that fits the
    # budget using padded layout sizes (double-buffered X, Gk and output).
    def _total_bytes(bt):
        if kfold:
            x_bytes = 2 * _padded_bytes((bt, k_rows), isz)
        else:
            x_bytes = 2 * _padded_bytes((T, bt, NL), isz)
        gk_bytes = 2 * _padded_bytes((k_rows, e_tile), isz)
        o_bytes = 2 * _padded_bytes((bt, e_tile), 4)
        return x_bytes + gk_bytes + o_bytes

    start = (min(B, 1024) // 8) * 8
    b_cands = [d for d in range(start, 7, -8) if B % d == 0] + [B]
    b_tile = next((bt for bt in b_cands if _total_bytes(bt) <= budget), b_cands[-1])

    grid = (P, B // b_tile, e_pad // e_tile)

    if kfold:
        kernel = _decode_kfold_kernel
        x_spec = pl.BlockSpec((pl.Squeezed(), b_tile, k_rows),
                              lambda p, j, e: (p, j, 0))
    else:
        kernel = _decode_mfold_kernel
        x_spec = pl.BlockSpec((pl.Squeezed(), T, b_tile, NL),
                              lambda p, j, e: (p, 0, j, 0))

    gk_spec = pl.BlockSpec((k_rows, e_tile), lambda p, j, e: (0, e))
    out_spec = pl.BlockSpec((pl.Squeezed(), b_tile, e_tile),
                            lambda p, j, e: (p, j, e))

    cost = pl.CostEstimate(
        flops=int(2 * P * T * B * NL * e_pad),
        transcendentals=0,
        bytes_accessed=int((P * T * B * NL + k_rows * e_pad) * isz
                           + P * B * e_pad * 4),
    )

    out = pl.pallas_call(
        kernel,
        out_shape=jax.ShapeDtypeStruct((P, B, e_pad), jnp.float32),
        grid=grid,
        in_specs=[x_spec, gk_spec],
        out_specs=out_spec,
        compiler_params=pltpu.CompilerParams(
            dimension_semantics=("parallel", "parallel", "arbitrary"),
            vmem_limit_bytes=budget,
        ),
        cost_estimate=cost,
    )(x_op, gk_op)

    # Drop the lane padding. (A consumer that can take the padded (P, B, e_pad)
    # buffer directly would skip this extra HBM read/write.)
    return out[:, :, :E]


def decoder_reference(inputs, grad, num_nodes, num_edges, output_dim):
    """Pure-JAX reference mirroring the PyTorch forward literally."""
    P, T, B, NL = inputs.shape
    x = inputs.reshape(P, T, B, num_nodes, -1)
    x = jnp.swapaxes(x, -2, -1)                    # (P, T, B, L, N)
    L = x.shape[-2]
    out = jnp.matmul(x, grad)                      # (P, T, B, L, E)
    out = out.reshape(P, T, B, L, num_edges, output_dim)
    out = jnp.mean(jnp.mean(out, axis=3), axis=1)  # (P, B, num_edges, output_dim)
    return out.reshape(P, B, -1)


def _make_ring_graph(num_nodes):
    adj = np.zeros((num_nodes, num_nodes), dtype=np.float32)
    for i in range(num_nodes):
        adj[i, (i + 1) % num_nodes] = 1.0
        adj[(i + 1) % num_nodes, i] = 1.0
    return graph_grad_np(adj)


if __name__ == "__main__":
    key = jax.random.PRNGKey(0)
    k1, k2 = jax.random.split(key)

    # --- Config 1: small, lane-sparse NL (=32) -> exercises the K-fold path.
    num_nodes, latent_dim, num_pred, n_traj, batch, output_dim = 8, 4, 6, 3, 2, 1
    grad_np = _make_ring_graph(num_nodes)
    num_edges = grad_np.shape[1] // output_dim
    grad = jnp.asarray(grad_np, dtype=jnp.float32)
    inputs = jax.random.normal(
        k1, (num_pred, n_traj, batch, num_nodes * latent_dim), dtype=jnp.float32)

    out = jax.block_until_ready(
        decoder_forward(inputs, grad, num_nodes, num_edges, output_dim))
    ref = jax.block_until_ready(
        decoder_reference(inputs, grad, num_nodes, num_edges, output_dim))
    assert out.shape == (num_pred, batch, num_edges * output_dim), out.shape
    np.testing.assert_allclose(np.asarray(out), np.asarray(ref), rtol=1e-5, atol=1e-5)

    # bf16 inputs / operator, f32 accumulation (numerics tradeoff -> looser tol).
    out_bf16 = jax.block_until_ready(
        decoder_forward(inputs, grad, num_nodes, num_edges, output_dim, use_bf16=True))
    np.testing.assert_allclose(np.asarray(out_bf16), np.asarray(ref), rtol=5e-2, atol=5e-2)

    # --- Config 2: NL = 128 -> exercises the M-fold (T*b_tile matmul) path.
    num_nodes2, latent_dim2, num_pred2, n_traj2, batch2, output_dim2 = 32, 4, 4, 2, 16, 1
    grad_np2 = _make_ring_graph(num_nodes2)
    num_edges2 = grad_np2.shape[1] // output_dim2
    grad2 = jnp.asarray(grad_np2, dtype=jnp.float32)
    inputs2 = jax.random.normal(
        k2, (num_pred2, n_traj2, batch2, num_nodes2 * latent_dim2), dtype=jnp.float32)

    out2 = jax.block_until_ready(
        decoder_forward(inputs2, grad2, num_nodes2, num_edges2, output_dim2))
    ref2 = jax.block_until_ready(
        decoder_reference(inputs2, grad2, num_nodes2, num_edges2, output_dim2))
    assert out2.shape == (num_pred2, batch2, num_edges2 * output_dim2), out2.shape
    np.testing.assert_allclose(np.asarray(out2), np.asarray(ref2), rtol=1e-5, atol=1e-5)

    print("KERNEL_OK")
</pallas_src>

<mosaic_0001>
module attributes {stable_mosaic.version = 11 : i64} {
  func.func @_decode_kfold_kernel(%arg0: i32, %arg1: i32, %arg2: i32, %arg3: memref<1x2x96xf32, #tpu.memory_space<vmem>>, %arg4: memref<96x128xf32, #tpu.memory_space<vmem>>, %arg5: memref<1x2x128xf32, #tpu.memory_space<vmem>>) attributes {dimension_semantics = [#tpu.dimension_semantics<parallel>, #tpu.dimension_semantics<parallel>, #tpu.dimension_semantics<arbitrary>], iteration_bounds = array<i64: 6, 1, 1>, scalar_prefetch = 0 : i64, scratch_operands = 0 : i64, tpu.core_type = #tpu.core_type<tc>, window_params = [{transform_indices = @transform_0, window_bounds = array<i64: 1, 2, 96>}, {transform_indices = @transform_1, window_bounds = array<i64: 96, 128>}, {transform_indices = @transform_2, window_bounds = array<i64: 1, 2, 128>}]} {
    %c0 = arith.constant 0 : index
    %c0_0 = arith.constant 0 : index
    %c0_1 = arith.constant 0 : index
    %0 = vector.load %arg3[%c0, %c0_0, %c0_1] : memref<1x2x96xf32, #tpu.memory_space<vmem>>, vector<1x2x96xf32>
    %1 = vector.shape_cast %0 : vector<1x2x96xf32> to vector<2x96xf32>
    %c0_2 = arith.constant 0 : index
    %c0_3 = arith.constant 0 : index
    %2 = vector.load %arg4[%c0_2, %c0_3] : memref<96x128xf32, #tpu.memory_space<vmem>>, vector<96x128xf32>
    %cst = arith.constant dense<0.000000e+00> : vector<2x128xf32>
    %3 = tpu.matmul %1, %2, %cst {dimension_numbers = #tpu.dot_dimension_numbers<[1], [0], [0], [1], [0, 0, 1, 1], [], []>} : vector<2x96xf32>, vector<96x128xf32>, vector<2x128xf32> -> vector<2x128xf32>
    %c0_4 = arith.constant 0 : index
    %c0_5 = arith.constant 0 : index
    %c0_6 = arith.constant 0 : index
    %4 = vector.load %arg5[%c0_4, %c0_5, %c0_6] : memref<1x2x128xf32, #tpu.memory_space<vmem>>, vector<1x2x128xf32>
    %5 = vector.shape_cast %4 : vector<1x2x128xf32> to vector<2x128xf32>
    %6 = vector.shape_cast %3 : vector<2x128xf32> to vector<1x2x128xf32>
    tpu.vector_store %arg5[%c0_4, %c0_5, %c0_6], %6 {strides = array<i32>} : memref<1x2x128xf32, #tpu.memory_space<vmem>>, vector<1x2x128xf32>,
    return
  }
  func.func @transform_0(%arg0: i32, %arg1: i32, %arg2: i32) -> (i32, i32, i32) {
    %c0_i32 = arith.constant 0 : i32
    %c0_i32_0 = arith.constant 0 : i32
    return %arg0, %arg1, %c0_i32 : i32, i32, i32
  }
  func.func @transform_1(%arg0: i32, %arg1: i32, %arg2: i32) -> (i32, i32) {
    %c0_i32 = arith.constant 0 : i32
    %c0_i32_0 = arith.constant 0 : i32
    return %c0_i32, %arg2 : i32, i32
  }
  func.func @transform_2(%arg0: i32, %arg1: i32, %arg2: i32) -> (i32, i32, i32) {
    %c0_i32 = arith.constant 0 : i32
    return %arg0, %arg1, %arg2 : i32, i32, i32
  }
}

</mosaic_0001>

<bundles_post_ra>
// kernel: tpu_custom_call.1
= control target key start
LH: loop header
LB: loop body
LE: loop exit
PB: predicated region body
PF: predicated region fallthrough
CT: control target
= control target key end

     0   :  { %7 = vsyncpa [#allocation3], 0  ;;  %s765_s0 = inlined_call_operand.hbm [shape: f32[6,2,96], index: 0, kind: input, shape index: {}]   ;;  %s766_s1 = inlined_call_operand.hbm [shape: f32[96,128], index: 1, kind: input, shape index: {}]   ;;  %s767_s2 = inlined_call_operand.hbm [shape: f32[6,2,128], index: 2, kind: output, shape index: {}]  }
   0x1   :  { %9 = vsyncpa [#allocation3 + $0x1], 0 }
   0x2   :  { %10 = vsyncpa [#allocation6], 0 }
   0x3   :  { %11 = vsyncpa [#allocation4], 0 }
   0x4   :  { %13 = vsyncpa [#allocation4 + $0x1], 0  ;;  %s620_s9 = smov 0   ;;  %s622_s10 = smov 0  }
   0x5   :  { %s624_s11 = smov 0   ;;  %s626_s12 = smov 0  }
   0x6   :  { %s628_s13 = smov 0   ;;  %s630_s14 = smov 0  }
   0x7 LB: > { %s363_s15 = sadd.s32 4294967295, %s600_s14   ;;  %p365_p0 = scmp.ge.s32.totalorder %s600_s14, 1  ;;  %s600_s14 = sphi %s630_s14, %s19_s14   ;;  %s596_s13 = sphi %s628_s13, %s778_s13   ;;  %s592_s12 = sphi %s626_s12, %s777_s12   ;;  %s588_s11 = sphi %s624_s11, %s776_s11   ;;  %s584_s10 = sphi %s622_s10, %s775_s10   ;;  %s580_s9 = sphi %s620_s9, %s774_s9  }
   0x8   : > { %p652_p1 = scmp.eq.s32.totalorder %s363_s15, 0  ;;  %p127_p2 = scmp.lt.s32.totalorder %s600_s14, 7 }
   0x9   : > { %s140_s19 = sshll.u32 %s766_s1, 4  ;;  %s602_s21 = smov [#allocation5]   ;;  %s141_s19 = int_to_ptr.hbm [resolvable:$true] %s140_s19 }
   0xa   : > { %p660_p3 = pnand %p365_p0, %p127_p2  ;;  %s142_s22 = sshll.u32 %s602_s21, 4  ;;  %s143_s22 = int_to_ptr.vmem [resolvable:$true] %s142_s22 }
   0xb   : > { %s603_s23 = smov 128   ;;  %s604_s24 = smov 8  }
   0xc   : > { %p387_p4 = pneg %p660_p3  ;;  %s364_s25 = sadd.s32 4294967294, %s600_s14  }
   0xd   : > { %s38_s26 = sadd.s32 1, %s596_s13  ;;  %s47_s27 = sadd.s32 1, %s588_s11 }
   0xe   : > { %p388_p5 = pnand %p387_p4, %p652_p1  ;;  %p40_p6 = scmp.ge.s32.totalorder %s38_s26, 6 }
   0xf   : > { %p54_p7 = scmp.ne.s32.totalorder %s588_s11, %s584_s10  ;;  %p55_p8 = scmp.eq.s32.totalorder %s600_s14, 0 }
  0x10   : > { %390 = dma.hbm_to_vmem [thread:$0]  (!%p388_p5), %s141_s19, 1536, %s143_s22, [#allocation6], %s603_s23, %s603_s23, %s604_s24  }
  0x11   : > { %p60_p9 = scmp.ne.s32.totalorder %s584_s10, %s580_s9  ;;  %s780_s26 = smov (%p40_p6, %s38_s26), 0 }
  0x12   : > { %p678_p10 = por %p55_p8, %p54_p7  ;;  %s42_s30 = ssub.s32 %s596_s13, %s780_s26 }
  0x13   : > { %p684_p11 = por %p652_p1, %p60_p9  ;;  %p114_p12 = scmp.eq.s32.totalorder %s363_s15, 5 }
  0x14   : > { %p45_p13 = scmp.eq.s32.totalorder %s42_s30, 0  ;;  %p120_p0 = scmp.eq.s32.totalorder %s364_s25, 5 }
  0x15   : > { %p690_p2 = por %p114_p12, %p54_p7  ;;  %p400_p4 = scmp.lt.s32.totalorder %s600_s14, 6 }
  0x16   : > { %s696_s4 = scalar_select %p45_p13, %s588_s11, %s47_s27  }
  0x17   : > { %p698_p5 = por %p120_p0, %p60_p9  ;;  %s156_s6 = sand.u32 1, %s588_s11  }
  0x18   : > { %s368_s7 = sshll.u32 %s156_s6, 1  ;;  %s369_s8 = sshll.u32 %s596_s13, 1 }
  0x19   : > { %s165_s15 = scalar_lea.hbm %s765_s0, %s369_s8  ;;  %s160_s19 = scalar_lea.vmem [#allocation2], %s368_s7 }
  0x1a   : > { %s169_s21 = sshll.u32 %s160_s19, 4  ;;  %s167_s22 = sshll.u32 %s165_s15, 4  ;;  %s170_s21 = int_to_ptr.vmem [resolvable:$true] %s169_s21  ;;  %s168_s22 = int_to_ptr.hbm [resolvable:$true] %s167_s22 }
  0x1b   : > { %p392_p6 = pnand %p400_p4, %p678_p10  ;;  %s157_s23 = scalar_lea.sflag [#allocation3], %s156_s6 }
  0x1c   : > { %178 = sbr.rel (%p660_p3) target bundleno = 189 (0xbd), region = 28  ;;  %s712_s24 = sand.u32 (!%p660_p3), 1, %s584_s10  }
  0x1d   : > { %394 = dma.hbm_to_vmem [thread:$0]  (!%p392_p6), %s168_s22, 32, %s170_s21, %s157_s23  }
  0x1e   : > { %s371_s25 = sshll.u32 (!%p660_p3), %s712_s24, 1  ;;  %s181_s27 = scalar_lea.sflag (!%p660_p3), [#allocation3], %s712_s24 }
  0x1f   : > { %s184_s30 = scalar_lea.vmem (!%p660_p3), [#allocation2], %s371_s25 }
  0x21   : > { %567 = dma.done.wait (%p684_p11), %s181_s27, 32  }
  0x22   : > { %569 = vsyncadd (%p684_p11), %s181_s27, 4294967264 }
  0x23   : > { %571 = dma.done.wait (%p652_p1), [#allocation6], 1536  }
  0x24   : > { %573 = vsyncadd (%p652_p1), [#allocation6], 4294965760  ;;  %v223_v0 = vld [vmem:[#allocation5 + $0x58] sm:$0xff]  ;;  %v222_v1 = vld [vmem:[#allocation5 + $0x50] sm:$0xff]  ;;  %vm224_vm0 = vcmask 785408   ;;  %s376_s16 = sshll.u32 %s592_s12, 1 }
  0x25   : > { %232 = vmatpush.msra.mxu0 %v223_v0  ;;  %v221_v2 = vld [vmem:[#allocation5 + $0x48] sm:$0xff]  ;;  %v220_v3 = vld [vmem:[#allocation5 + $0x40] sm:$0xff]  ;;  %v219_v4 = vld [vmem:[#allocation5 + $0x38] sm:$0xff]  ;;  %s262_s29 = scalar_lea.hbm %s767_s2, %s376_s16  ;;  %s210_s6 = scalar_lea.vmem [#allocation7], %s371_s25 }
  0x26   : > { %v218_v5 = vld [vmem:[#allocation5 + $0x30] sm:$0xff]  ;;  %v217_v6 = vld [vmem:[#allocation5 + $0x28] sm:$0xff]  ;;  %v216_v7 = vld [vmem:[#allocation5 + $0x20] sm:$0xff]  ;;  %s264_s7 = sshll.u32 %s210_s6, 4  ;;  %s266_s8 = sshll.u32 %s262_s29, 4  ;;  %s265_s7 = int_to_ptr.vmem [resolvable:$true] %s264_s7  ;;  %s267_s8 = int_to_ptr.hbm [resolvable:$true] %s266_s8 }
  0x27   : > { %233 = vmatpush.msra.mxu0 %v222_v1  ;;  %v215_v8 = vld [vmem:[#allocation5 + $0x18] sm:$0xff]  ;;  %v214_v9 = vld [vmem:[#allocation5 + $0x10] sm:$0xff]  ;;  %v213_v10 = vld [vmem:[#allocation5 + $0x8] sm:$0xff]  ;;  %s250_s17 = scalar_lea.sflag [#allocation4], %s712_s24  ;;  %s528_s18 = sshra.s32 %s267_s8, 4  ;;  %s529_s18 = int_to_ptr.hbm [resolvable:$true] %s528_s18 }
  0x28   : > { %v212_v11 = vld [vmem:[#allocation5] sm:$0xff]  ;;  %v211_v12 = vld [vmem:[%s184_s30] sm:$0x3]  ;;  %s530_s15 = scalar_lea.hbm %s529_s18, 2  ;;  %s534_s21 = scalar_lea.hbm %s767_s2, 12 }
  0x29   : > { %234 = vmatpush.msra.mxu0 %v221_v2  ;;  %p531_p1 = scmp.ne.s32.totalorder %s529_s18, %s530_s15  ;;  %p535_p8 = scmp.lt.s32.totalorder %s529_s18, %s767_s2 }
  0x2a   : > { %p536_p9 = scmp.lt.s32.totalorder %s534_s21, %s530_s15 }
  0x2b   : > { %235 = vmatpush.msra.mxu0 %v220_v3  ;;  %p532_p3 = pnand %p531_p1, %p690_p2 }
  0x2c   : > { %p537_p10 = por %p536_p9, %p535_p8 }
  0x2d   : > { %236 = vmatpush.msra.mxu0 %v219_v4  ;;  %p533_p7 = pneg %p532_p3 }
  0x2f   : > { %237 = vmatpush.msra.mxu0 %v218_v5  ;;  %p538_p11 = pnand %p537_p10, %p533_p7 }
  0x31   : > { %238 = vmatpush.msra.mxu0 %v217_v6 }
  0x33   : > { %239 = vmatpush.msra.mxu0 %v216_v7 }
  0x35   : > { %240 = vmatpush.msra.mxu0 %v215_v8 }
  0x37   : > { %241 = vmatpush.msra.mxu0 %v214_v9 }
  0x39   : > { %242 = vmatpush.msra.mxu0 %v213_v10 }
  0x3b   : > { %243 = vmatpush.msra.mxu0 %v212_v11 }
  0x3c   : > { %374 = vmatmul.msk.f32.vlgmr.msra.gmra.mxu0 %vm224_vm0, %v211_v12 }
  0xb9   : > { %v245_v13 = vpop.f32.mrf.mxu0 }
  0xba   : > { %248 = vst [vmem:[%s210_s6] sm:$0x3] %v245_v13 }
  0xbb   : > { %541 = shalt.err (!%p538_p11)
}
  0xbc   : > { %385 = dma.vmem_to_hbm [thread:$0]  (%p690_p2), %s265_s7, 32, %s267_s8, %s250_s17  }
  0xbd PF: > { %p402_p12 = scmp.ge.s32.totalorder %s600_s14, 2  ;;  %s278_s24 = sand.u32 1, %s580_s9  }
  0xbe   : > { %s279_s25 = scalar_lea.sflag [#allocation4], %s278_s24 }
  0xbf   : > { %p396_p13 = pnand %p402_p12, %p698_p5 }
  0xc1   : > { %p397_p0 = pneg %p396_p13 }
  0xc3   : > { %575 = dma.done.wait (%p397_p0), %s279_s25, 32  }
  0xc4   : > { %577 = vsyncadd (%p397_p0), %s279_s25, 4294967264  ;;  %s19_s14 = sadd.s32 1, %s600_s14   ;;  %s774_s9 = smov %s584_s10 }
  0xc5   : > { %p16_p4 = scmp.ge.s32.totalorder %s19_s14, 8   ;;  %s775_s10 = smov %s588_s11 }
  0xc6   : > { %s776_s11 = smov %s696_s4  ;;  %s777_s12 = smov %s596_s13 }
  0xc7   : > { %s778_s13 = smov %s780_s26  ;;  %18 = sbr.rel (!%p16_p4) target bundleno = 7 (0x7), region = 78 }
  0xcc   :  { %285 = vsyncpa [#allocation3], 1 }
  0xcd   :  { %287 = vsyncpa [#allocation3 + $0x1], 1 }
  0xce   :  { %288 = vsyncpa [#allocation6], 1 }
  0xcf   :  { %289 = vsyncpa [#allocation4], 1 }
  0xd0   :  { %291 = vsyncpa [#allocation4 + $0x1], 1 }

</bundles_post_ra>
